<compile_context>
chip_gen: v7x
topology: tpu7x:2x2x1
jax: 0.10.0
libtpu: 0.0.40
codegen_flags: <defaults>
</compile_context>

<pallas_src>
import functools

import jax
import jax.numpy as jnp
from jax.experimental import pallas as pl
from jax.experimental.pallas import tpu as pltpu

BN_EPS = 1e-5  # nn.BatchNorm2d default


def _fused_conv_bn_relu_kernel(x_ref, w_ref, gamma_ref, beta_ref, o_ref,
                               *, KH, KW, W, Wo, Ho):
    """One grid step = one sample's conv; the last step finalizes BN + ReLU.

    x_ref:     (1, Cin, Ppad)     bf16  flattened channel-major padded image
    w_ref:     (Cout, KH*KW*Cin)  bf16  weight with K = KH*KW*Cin contraction dim
    gamma_ref: (1, Cout, 1)       f32
    beta_ref:  (1, Cout, 1)       f32
    o_ref:     (N, Cout, Ho*Wo)   f32   whole output resident in VMEM across grid
    """
    n = pl.program_id(0)
    Pout = Ho * W          # flattened columns before compaction
    PoutC = Ho * Wo        # compact (valid) columns

    x = x_ref[0]           # (Cin, Ppad) bf16, already in VMEM

    # In-VMEM im2col: stack the KH*KW lane-shifted tap views along sublanes so
    # the whole conv is a single MXU matmul with K = KH*KW*Cin.
    taps = []
    for kh in range(KH):
        for kw in range(KW):
            s = kh * W + kw
            taps.append(x[:, s:s + Pout])                 # (Cin, Pout) shifted view
    rhs = jnp.concatenate(taps, axis=0)                   # (KH*KW*Cin, Pout) bf16
    acc = jnp.dot(w_ref[...], rhs,
                  preferred_element_type=jnp.float32)     # (Cout, Pout) f32
    # NOTE: conv bias intentionally omitted -- training-mode BatchNorm's mean
    # subtraction cancels a constant per-channel bias exactly.

    # Compact the W-strided columns (keep wo < Wo) so the stored output is dense.
    compact = jnp.concatenate(
        [acc[:, ho * W: ho * W + Wo] for ho in range(Ho)], axis=1)  # (Cout, Ho*Wo)
    o_ref[pl.ds(n, 1)] = compact[None, :, :]

    # Last step: every sample's conv result is resident -> global BN + ReLU.
    @pl.when(n == pl.num_programs(0) - 1)
    def _():
        y = o_ref[...]                                    # (N, Cout, Ho*Wo) f32
        cnt = jnp.float32(y.shape[0] * PoutC)
        s1 = jnp.sum(y, axis=2, keepdims=True)            # (N, Cout, 1)
        s2 = jnp.sum(y * y, axis=2, keepdims=True)        # (N, Cout, 1)
        mean = jnp.sum(s1, axis=0, keepdims=True) / cnt   # (1, Cout, 1)
        var = jnp.sum(s2, axis=0, keepdims=True) / cnt - mean * mean
        inv_std = jax.lax.rsqrt(jnp.maximum(var, 0.0) + BN_EPS)
        scale = gamma_ref[...] * inv_std                  # (1, Cout, 1)
        shift = beta_ref[...] - mean * scale
        o_ref[...] = jnp.maximum(y * scale + shift, 0.0)


@jax.jit
def basic_conv2d(x_nchw, w_oihw, b, gamma, beta):
    """x_nchw: (N, Cin, H, W). w_oihw: (Cout, Cin, KH, KW). Stride 1, no padding."""
    N, Cin, H, W = x_nchw.shape
    Cout, _, KH, KW = w_oihw.shape
    Ho, Wo = H - KH + 1, W - KW + 1
    Pout = Ho * W
    # Pad only to the largest tap shift; block last dim == full dim, so no
    # 128 round-up is required.
    Ppad = Pout + (KH - 1) * W + (KW - 1)

    # ---- glue (free reshape + tiny pad/cast); no im2col materialized in HBM ----
    x_flat = x_nchw.reshape(N, Cin, H * W).astype(jnp.bfloat16)
    x_pad = jnp.pad(x_flat, ((0, 0), (0, 0), (0, Ppad - H * W)))

    # w2d[co, (kh*KW + kw)*Cin + ci] = w_oihw[co, ci, kh, kw]
    w2d = jnp.transpose(w_oihw, (0, 2, 3, 1)).reshape(Cout, KH * KW * Cin)
    w2d = w2d.astype(jnp.bfloat16)
    gamma3 = gamma.reshape(1, Cout, 1).astype(jnp.float32)
    beta3 = beta.reshape(1, Cout, 1).astype(jnp.float32)
    del b  # exact no-op under training-mode BN (absorbed by mean subtraction)

    kernel = functools.partial(_fused_conv_bn_relu_kernel,
                               KH=KH, KW=KW, W=W, Wo=Wo, Ho=Ho)
    cost = pl.CostEstimate(
        flops=2 * N * Ho * Wo * Cout * KH * KW * Cin,
        transcendentals=Cout,
        bytes_accessed=(x_pad.size * 2 + w2d.size * 2
                        + gamma3.size * 4 + beta3.size * 4
                        + N * Cout * Ho * Wo * 4),
    )

    # Batch axis is "arbitrary": the global-batch BN statistics require the
    # resident output accumulator, so the grid must run sequentially.
    y = pl.pallas_call(
        kernel,
        grid=(N,),
        in_specs=[
            pl.BlockSpec((1, Cin, Ppad), lambda n: (n, 0, 0)),
            pl.BlockSpec((Cout, KH * KW * Cin), lambda n: (0, 0)),
            pl.BlockSpec((1, Cout, 1), lambda n: (0, 0, 0)),
            pl.BlockSpec((1, Cout, 1), lambda n: (0, 0, 0)),
        ],
        out_specs=pl.BlockSpec((N, Cout, Ho * Wo), lambda n: (0, 0, 0)),
        out_shape=jax.ShapeDtypeStruct((N, Cout, Ho * Wo), jnp.float32),
        compiler_params=pltpu.CompilerParams(
            dimension_semantics=("arbitrary",),
            vmem_limit_bytes=32 * 1024 * 1024),
        cost_estimate=cost,
    )(x_pad, w2d, gamma3, beta3)

    # Output is already compact and channel-major: free contiguous reshape only.
    return y.reshape(N, Cout, Ho, Wo)


if __name__ == "__main__":
    # Small shapes consistent with the module: N=2, Cin=4, H=W=16, Cout=8, k=3.
    N, Cin, H, W = 2, 4, 16, 16
    Cout, KH, KW = 8, 3, 3

    key = jax.random.PRNGKey(0)
    kx, kwt, kb = jax.random.split(key, 3)

    x = jax.random.normal(kx, (N, Cin, H, W), dtype=jnp.float32)
    fan_in = Cin * KH * KW
    bound = 1.0 / (fan_in ** 0.5)
    w = jax.random.uniform(kwt, (Cout, Cin, KH, KW), jnp.float32, -bound, bound)
    b = jax.random.uniform(kb, (Cout,), jnp.float32, -bound, bound)
    gamma = jnp.ones((Cout,), jnp.float32)   # BatchNorm2d default weight
    beta = jnp.zeros((Cout,), jnp.float32)   # BatchNorm2d default bias

    out = basic_conv2d(x, w, b, gamma, beta)
    out = jax.block_until_ready(out)
    assert out.shape == (N, Cout, H - KH + 1, W - KW + 1)

    # f32 reference (conv + train-mode BN + ReLU); loose tol for bf16 MXU inputs.
    ref_y = jax.lax.conv_general_dilated(
        x, w, window_strides=(1, 1), padding="VALID",
        dimension_numbers=("NCHW", "OIHW", "NCHW"),
        precision=jax.lax.Precision.HIGHEST) + b.reshape(1, Cout, 1, 1)
    mu = ref_y.mean(axis=(0, 2, 3), keepdims=True)
    vr = ((ref_y - mu) ** 2).mean(axis=(0, 2, 3), keepdims=True)
    ref = jnp.maximum(
        (ref_y - mu) * jax.lax.rsqrt(vr + BN_EPS) * gamma.reshape(1, Cout, 1, 1)
        + beta.reshape(1, Cout, 1, 1), 0.0)
    assert float(jnp.max(jnp.abs(out - ref))) < 1e-1

    print("KERNEL_OK")
</pallas_src>

<mosaic_0001>
module attributes {stable_mosaic.version = 11 : i64} {
  func.func @_fused_conv_bn_relu_kernel(%arg0: i32, %arg1: memref<1x4x258xbf16, #tpu.memory_space<vmem>>, %arg2: memref<8x36xbf16, #tpu.memory_space<vmem>>, %arg3: memref<1x8x1xf32, #tpu.memory_space<vmem>>, %arg4: memref<1x8x1xf32, #tpu.memory_space<vmem>>, %arg5: memref<2x8x196xf32, #tpu.memory_space<vmem>>) attributes {dimension_semantics = [#tpu.dimension_semantics<arbitrary>], iteration_bounds = array<i64: 2>, scalar_prefetch = 0 : i64, scratch_operands = 0 : i64, tpu.core_type = #tpu.core_type<tc>, window_params = [{transform_indices = @transform_0, window_bounds = array<i64: 1, 4, 258>}, {pipeline_mode = #tpu.pipeline_mode<synchronous>, transform_indices = @transform_1, window_bounds = array<i64: 8, 36>}, {pipeline_mode = #tpu.pipeline_mode<synchronous>, transform_indices = @transform_2, window_bounds = array<i64: 1, 8, 1>}, {pipeline_mode = #tpu.pipeline_mode<synchronous>, transform_indices = @transform_3, window_bounds = array<i64: 1, 8, 1>}, {pipeline_mode = #tpu.pipeline_mode<synchronous>, transform_indices = @transform_4, window_bounds = array<i64: 2, 8, 196>}]} {
    %c0 = arith.constant 0 : index
    %c0_0 = arith.constant 0 : index
    %c0_1 = arith.constant 0 : index
    %0 = vector.load %arg1[%c0, %c0_0, %c0_1] : memref<1x4x258xbf16, #tpu.memory_space<vmem>>, vector<1x4x258xbf16>
    %1 = vector.shape_cast %0 : vector<1x4x258xbf16> to vector<4x258xbf16>
    %2 = vector.extract_strided_slice %1 {offsets = [0, 0], sizes = [4, 224], strides = [1, 1]} : vector<4x258xbf16> to vector<4x224xbf16>
    %3 = vector.extract_strided_slice %1 {offsets = [0, 1], sizes = [4, 224], strides = [1, 1]} : vector<4x258xbf16> to vector<4x224xbf16>
    %4 = vector.extract_strided_slice %1 {offsets = [0, 2], sizes = [4, 224], strides = [1, 1]} : vector<4x258xbf16> to vector<4x224xbf16>
    %5 = vector.extract_strided_slice %1 {offsets = [0, 16], sizes = [4, 224], strides = [1, 1]} : vector<4x258xbf16> to vector<4x224xbf16>
    %6 = vector.extract_strided_slice %1 {offsets = [0, 17], sizes = [4, 224], strides = [1, 1]} : vector<4x258xbf16> to vector<4x224xbf16>
    %7 = vector.extract_strided_slice %1 {offsets = [0, 18], sizes = [4, 224], strides = [1, 1]} : vector<4x258xbf16> to vector<4x224xbf16>
    %8 = vector.extract_strided_slice %1 {offsets = [0, 32], sizes = [4, 224], strides = [1, 1]} : vector<4x258xbf16> to vector<4x224xbf16>
    %9 = vector.extract_strided_slice %1 {offsets = [0, 33], sizes = [4, 224], strides = [1, 1]} : vector<4x258xbf16> to vector<4x224xbf16>
    %10 = vector.extract_strided_slice %1 {offsets = [0, 34], sizes = [4, 224], strides = [1, 1]} : vector<4x258xbf16> to vector<4x224xbf16>
    %11 = tpu.concatenate %2, %3, %4, %5, %6, %7, %8, %9, %10 in 0 : vector<4x224xbf16>, vector<4x224xbf16>, vector<4x224xbf16>, vector<4x224xbf16>, vector<4x224xbf16>, vector<4x224xbf16>, vector<4x224xbf16>, vector<4x224xbf16>, vector<4x224xbf16> -> vector<36x224xbf16>
    %c0_2 = arith.constant 0 : index
    %c0_3 = arith.constant 0 : index
    %12 = vector.load %arg2[%c0_2, %c0_3] : memref<8x36xbf16, #tpu.memory_space<vmem>>, vector<8x36xbf16>
    %cst = arith.constant dense<0.000000e+00> : vector<8x224xf32>
    %13 = tpu.matmul %12, %11, %cst {dimension_numbers = #tpu.dot_dimension_numbers<[1], [0], [0], [1], [0, 0, 1, 1], [], []>} : vector<8x36xbf16>, vector<36x224xbf16>, vector<8x224xf32> -> vector<8x224xf32>
    %14 = vector.extract_strided_slice %13 {offsets = [0, 0], sizes = [8, 14], strides = [1, 1]} : vector<8x224xf32> to vector<8x14xf32>
    %15 = vector.extract_strided_slice %13 {offsets = [0, 16], sizes = [8, 14], strides = [1, 1]} : vector<8x224xf32> to vector<8x14xf32>
    %16 = vector.extract_strided_slice %13 {offsets = [0, 32], sizes = [8, 14], strides = [1, 1]} : vector<8x224xf32> to vector<8x14xf32>
    %17 = vector.extract_strided_slice %13 {offsets = [0, 48], sizes = [8, 14], strides = [1, 1]} : vector<8x224xf32> to vector<8x14xf32>
    %18 = vector.extract_strided_slice %13 {offsets = [0, 64], sizes = [8, 14], strides = [1, 1]} : vector<8x224xf32> to vector<8x14xf32>
    %19 = vector.extract_strided_slice %13 {offsets = [0, 80], sizes = [8, 14], strides = [1, 1]} : vector<8x224xf32> to vector<8x14xf32>
    %20 = vector.extract_strided_slice %13 {offsets = [0, 96], sizes = [8, 14], strides = [1, 1]} : vector<8x224xf32> to vector<8x14xf32>
    %21 = vector.extract_strided_slice %13 {offsets = [0, 112], sizes = [8, 14], strides = [1, 1]} : vector<8x224xf32> to vector<8x14xf32>
    %22 = vector.extract_strided_slice %13 {offsets = [0, 128], sizes = [8, 14], strides = [1, 1]} : vector<8x224xf32> to vector<8x14xf32>
    %23 = vector.extract_strided_slice %13 {offsets = [0, 144], sizes = [8, 14], strides = [1, 1]} : vector<8x224xf32> to vector<8x14xf32>
    %24 = vector.extract_strided_slice %13 {offsets = [0, 160], sizes = [8, 14], strides = [1, 1]} : vector<8x224xf32> to vector<8x14xf32>
    %25 = vector.extract_strided_slice %13 {offsets = [0, 176], sizes = [8, 14], strides = [1, 1]} : vector<8x224xf32> to vector<8x14xf32>
    %26 = vector.extract_strided_slice %13 {offsets = [0, 192], sizes = [8, 14], strides = [1, 1]} : vector<8x224xf32> to vector<8x14xf32>
    %27 = vector.extract_strided_slice %13 {offsets = [0, 208], sizes = [8, 14], strides = [1, 1]} : vector<8x224xf32> to vector<8x14xf32>
    %28 = tpu.concatenate %14, %15, %16, %17, %18, %19, %20, %21, %22, %23, %24, %25, %26, %27 in 1 : vector<8x14xf32>, vector<8x14xf32>, vector<8x14xf32>, vector<8x14xf32>, vector<8x14xf32>, vector<8x14xf32>, vector<8x14xf32>, vector<8x14xf32>, vector<8x14xf32>, vector<8x14xf32>, vector<8x14xf32>, vector<8x14xf32>, vector<8x14xf32>, vector<8x14xf32> -> vector<8x196xf32>
    %29 = vector.shape_cast %28 : vector<8x196xf32> to vector<1x8x196xf32>
    %30 = arith.index_cast %arg0 : i32 to index
    %c0_4 = arith.constant 0 : index
    %c0_5 = arith.constant 0 : index
    %31 = vector.load %arg5[%30, %c0_4, %c0_5] : memref<2x8x196xf32, #tpu.memory_space<vmem>>, vector<1x8x196xf32>
    tpu.vector_store %arg5[%30, %c0_4, %c0_5], %29 {strides = array<i32>} : memref<2x8x196xf32, #tpu.memory_space<vmem>>, vector<1x8x196xf32>,
    %c1_i32 = arith.constant 1 : i32
    %32 = arith.cmpi eq, %arg0, %c1_i32 : i32
    %33 = arith.extui %32 : i1 to i32
    %c0_i32 = arith.constant 0 : i32
    %34 = arith.cmpi ne, %33, %c0_i32 : i32
    scf.if %34 {
      %c0_6 = arith.constant 0 : index
      %c0_7 = arith.constant 0 : index
      %c0_8 = arith.constant 0 : index
      %35 = vector.load %arg5[%c0_6, %c0_7, %c0_8] : memref<2x8x196xf32, #tpu.memory_space<vmem>>, vector<2x8x196xf32>
      %cst_9 = arith.constant dense<0.000000e+00> : vector<2x8xf32>
      %36 = vector.multi_reduction <add>, %35, %cst_9 [2] : vector<2x8x196xf32> to vector<2x8xf32>
      %37 = vector.shape_cast %36 : vector<2x8xf32> to vector<2x8x1xf32>
      %38 = arith.mulf %35, %35 : vector<2x8x196xf32>
      %cst_10 = arith.constant dense<0.000000e+00> : vector<2x8xf32>
      %39 = vector.multi_reduction <add>, %38, %cst_10 [2] : vector<2x8x196xf32> to vector<2x8xf32>
      %40 = vector.shape_cast %39 : vector<2x8xf32> to vector<2x8x1xf32>
      %cst_11 = arith.constant dense<0.000000e+00> : vector<8x1xf32>
      %41 = vector.multi_reduction <add>, %37, %cst_11 [0] : vector<2x8x1xf32> to vector<8x1xf32>
      %42 = vector.shape_cast %41 : vector<8x1xf32> to vector<1x8x1xf32>
      %cst_12 = arith.constant 3.920000e+02 : f32
      %43 = vector.broadcast %cst_12 : f32 to vector<1x8x1xf32>
      %44 = arith.divf %42, %43 : vector<1x8x1xf32>
      %cst_13 = arith.constant dense<0.000000e+00> : vector<8x1xf32>
      %45 = vector.multi_reduction <add>, %40, %cst_13 [0] : vector<2x8x1xf32> to vector<8x1xf32>
      %46 = vector.shape_cast %45 : vector<8x1xf32> to vector<1x8x1xf32>
      %cst_14 = arith.constant 3.920000e+02 : f32
      %47 = vector.broadcast %cst_14 : f32 to vector<1x8x1xf32>
      %48 = arith.divf %46, %47 : vector<1x8x1xf32>
      %49 = arith.mulf %44, %44 : vector<1x8x1xf32>
      %50 = arith.subf %48, %49 : vector<1x8x1xf32>
      %cst_15 = arith.constant 0.000000e+00 : f32
      %51 = vector.broadcast %cst_15 : f32 to vector<1x8x1xf32>
      %52 = arith.maximumf %50, %51 : vector<1x8x1xf32>
      %cst_16 = arith.constant 9.99999974E-6 : f32
      %53 = vector.broadcast %cst_16 : f32 to vector<1x8x1xf32>
      %54 = arith.addf %52, %53 : vector<1x8x1xf32>
      %55 = math.rsqrt %54 : vector<1x8x1xf32>
      %c0_17 = arith.constant 0 : index
      %c0_18 = arith.constant 0 : index
      %c0_19 = arith.constant 0 : index
      %56 = vector.load %arg3[%c0_17, %c0_18, %c0_19] : memref<1x8x1xf32, #tpu.memory_space<vmem>>, vector<1x8x1xf32>
      %57 = arith.mulf %56, %55 : vector<1x8x1xf32>
      %c0_20 = arith.constant 0 : index
      %c0_21 = arith.constant 0 : index
      %c0_22 = arith.constant 0 : index
      %58 = vector.load %arg4[%c0_20, %c0_21, %c0_22] : memref<1x8x1xf32, #tpu.memory_space<vmem>>, vector<1x8x1xf32>
      %59 = arith.mulf %44, %57 : vector<1x8x1xf32>
      %60 = arith.subf %58, %59 : vector<1x8x1xf32>
      %61 = vector.broadcast %57 : vector<1x8x1xf32> to vector<2x8x196xf32>
      %62 = arith.mulf %35, %61 : vector<2x8x196xf32>
      %63 = vector.broadcast %60 : vector<1x8x1xf32> to vector<2x8x196xf32>
      %64 = arith.addf %62, %63 : vector<2x8x196xf32>
      %cst_23 = arith.constant 0.000000e+00 : f32
      %65 = vector.broadcast %cst_23 : f32 to vector<2x8x196xf32>
      %66 = arith.maximumf %64, %65 : vector<2x8x196xf32>
      %c0_24 = arith.constant 0 : index
      %c0_25 = arith.constant 0 : index
      %c0_26 = arith.constant 0 : index
      %67 = vector.load %arg5[%c0_24, %c0_25, %c0_26] : memref<2x8x196xf32, #tpu.memory_space<vmem>>, vector<2x8x196xf32>
      tpu.vector_store %arg5[%c0_24, %c0_25, %c0_26], %66 {strides = array<i32>} : memref<2x8x196xf32, #tpu.memory_space<vmem>>, vector<2x8x196xf32>,
    } else {
    }
    return
  }
  func.func @transform_0(%arg0: i32) -> (i32, i32, i32) {
    %c0_i32 = arith.constant 0 : i32
    %c0_i32_0 = arith.constant 0 : i32
    %c0_i32_1 = arith.constant 0 : i32
    return %arg0, %c0_i32, %c0_i32_0 : i32, i32, i32
  }
  func.func @transform_1(%arg0: i32) -> (i32, i32) {
    %c0_i32 = arith.constant 0 : i32
    %c0_i32_0 = arith.constant 0 : i32
    %c0_i32_1 = arith.constant 0 : i32
    return %c0_i32, %c0_i32_0 : i32, i32
  }
  func.func @transform_2(%arg0: i32) -> (i32, i32, i32) {
    %c0_i32 = arith.constant 0 : i32
    %c0_i32_0 = arith.constant 0 : i32
    %c0_i32_1 = arith.constant 0 : i32
    %c0_i32_2 = arith.constant 0 : i32
    return %c0_i32, %c0_i32_0, %c0_i32_1 : i32, i32, i32
  }
  func.func @transform_3(%arg0: i32) -> (i32, i32, i32) {
    %c0_i32 = arith.constant 0 : i32
    %c0_i32_0 = arith.constant 0 : i32
    %c0_i32_1 = arith.constant 0 : i32
    %c0_i32_2 = arith.constant 0 : i32
    return %c0_i32, %c0_i32_0, %c0_i32_1 : i32, i32, i32
  }
  func.func @transform_4(%arg0: i32) -> (i32, i32, i32) {
    %c0_i32 = arith.constant 0 : i32
    %c0_i32_0 = arith.constant 0 : i32
    %c0_i32_1 = arith.constant 0 : i32
    %c0_i32_2 = arith.constant 0 : i32
    return %c0_i32, %c0_i32_0, %c0_i32_1 : i32, i32, i32
  }
}

</mosaic_0001>

<bundles_post_ra>
// kernel: basic_conv2d.1
= control target key start
LH: loop header
LB: loop body
LE: loop exit
PB: predicated region body
PF: predicated region fallthrough
CT: control target
= control target key end

     0   :  { %s629_s15 = smov 0   ;;  %s721_s0 = inlined_call_operand.vmem [shape: bf16[2,4,258], index: 0, kind: input, shape index: {}]   ;;  %s722_s1 = inlined_call_operand.vmem [shape: bf16[8,36], index: 1, kind: input, shape index: {}]   ;;  %s723_s2 = inlined_call_operand.vmem [shape: f32[1,8,1], index: 2, kind: input, shape index: {}]   ;;  %s724_s3 = inlined_call_operand.vmem [shape: f32[1,8,1], index: 3, kind: input, shape index: {}]   ;;  %s725_s4 = inlined_call_operand.vmem [shape: f32[2,8,196], index: 4, kind: output, shape index: {}]  }
   0x1 LB: > { %s635_s16 = sadd.s32 4294967295, %s581_s15   ;;  %p529_p0 = scmp.ge.s32.totalorder %s581_s15, 1  ;;  %s581_s15 = sphi %s629_s15, %s14_s15  }
   0x2   : > { %p157_p1 = scmp.lt.s32.totalorder %s581_s15, 3 }
   0x4   : > { %p158_p2 = pnand %p529_p0, %p157_p1 }
   0x5   : > { %p178_p3 = scmp.lt.s32.totalorder (!%p158_p2), %s635_s16, 1  ;;  %v189_v0 = vlaneseq (!%p158_p2)  ;;  %v583_v1 = vmov (!%p158_p2), 1983009808   ;;  %s584_s22 = smov (!%p158_p2), 111   ;;  %v590_v14 = vmov (!%p158_p2), 0   ;;  %vm207_vm0 = vcmask (!%p158_p2), 1039360  }
   0x6   : > { %161 = sbr.rel (%p158_p2) target bundleno = 845 (0x34d), region = 36  ;;  %v187_v2 = vunpack.c.l.s4 (!%p158_p2), %v583_v1  ;;  %s585_s23 = smov (!%p158_p2), 126   ;;  %345 = vmatprep.mubr.bf16.mxu0 (!%p158_p2), %v590_v14  ;;  %vm267_vm1 = vcmask (!%p158_p2), 1041408   ;;  %vm274_vm2 = vcmask (!%p158_p2), 1043456   ;;  %vm279_vm3 = vcmask (!%p158_p2), 1045504  }
   0x7   : > { %v190_v3 = vshrl.u32 (!%p158_p2), %v189_v0, 7  ;;  %s586_s24 = smov (!%p158_p2), 127   ;;  %s587_s25 = smov (!%p158_p2), 112   ;;  %vm214_vm4 = vcmask (!%p158_p2), 1031168   ;;  %vm221_vm5 = vcmask (!%p158_p2), 916480   ;;  %vm233_vm6 = vcmask (!%p158_p2), 900096  }
   0x8   : > { %v188_v4 = vunpack.c.0.s8 (!%p158_p2), %v187_v2  ;;  %s588_s26 = smov (!%p158_p2), 110   ;;  %s589_s27 = smov (!%p158_p2), 96   ;;  %vm247_vm7 = vcmask (!%p158_p2), 777216   ;;  %vm239_vm8 = vcmask (!%p158_p2), 785408   ;;  %vm227_vm9 = vcmask (!%p158_p2), 908288  }
   0x9   : > { %s591_s28 = smov (!%p158_p2), 95   ;;  %s592_s29 = smov (!%p158_p2), 94   ;;  %vm264_vm10 = vcmask (!%p158_p2), 769024   ;;  %v302_v58 = vld [vmem:[%s722_s1] sm:$0xf] (!%p158_p2)  ;;  %vm303_vm11 = vcmask (!%p158_p2), 293888  }
   0xa   : > { %v191_v5 = vsub.s32 (!%p158_p2), %v188_v4, %v190_v3  ;;  %s593_s6 = smov (!%p158_p2), 124   ;;  %s594_s7 = smov (!%p158_p2), 120   ;;  %vm395_vm12 = vcmask (!%p158_p2), 113664   ;;  %vm397_vm13 = vcmask (!%p158_p2), 228352   ;;  %vm399_vm14 = vcmask (!%p158_p2), 343040  }
   0xb   : > { %s595_s8 = smov (!%p158_p2), 122   ;;  %s596_s9 = smov (!%p158_p2), 116   ;;  %vm401_vm15 = vcmask (!%p158_p2), 457728  }
   0xc   : > { %s597_s10 = smov (!%p158_p2), 118   ;;  %s598_s11 = smov (!%p158_p2), 114  }
   0xd   : > { %s179_s17 = scalar_select %p178_p3, %s635_s16, 1 }
   0xe   : > { %s599_s12 = smov 108   ;;  %s600_s13 = smov 106  }
   0xf   : > { %s539_s18 = smul.u32 6, %s179_s17  ;;  %s601_s14 = smov 104  }
  0x10   : > { %s602_s17 = smov 102   ;;  %p535_p4 = scmp.ne.s32.totalorder %s635_s16, 1 }
  0x11   : > { %s182_s21 = scalar_lea.vmem %s721_s0, %s539_s18  ;;  %s538_s18 = sshll.u32 %s635_s16, 4 }
  0x12   : > { %v184_v6 = vld [vmem:[%s182_s21] sm:$0x3f]  ;;  %s423_s21 = scalar_lea.vmem %s725_s4, %s538_s18 }
  0x13   : > { %v192_v7 = vrot.slane %v184_v6, %v191_v5  ;;  %v194_v8 = vcombine.low %v184_v6, %v184_v6  ;;  %v250_v15 = vcombine.high %v184_v6, %v184_v6 }
  0x15   : > { %223 = vrot.lane.b32.xlu0 %v192_v7, %s584_s22  ;;  %212 = vrot.lane.b32.xlu1 %v192_v7, %s585_s23  ;;  %v201_v9 = vrot.slane %v194_v8, %v191_v5  ;;  %v209_v10 = vcombine.low %v192_v7, %v192_v7  ;;  %v193_v13 = vcombine.high %v192_v7, %v192_v7 }
  0x16   : > { %v257_v16 = vrot.slane %v250_v15, %v191_v5 }
  0x17   : > { %v202_v11 = vcombine.high %v201_v9, %v201_v9  ;;  %v216_v12 = vcombine.low %v201_v9, %v201_v9 }
  0x19   : > { %203 = vrot.lane.b32.xlu0 %v201_v9, %s586_s24  ;;  %210 = vrot.lane.b32.xlu1 %v209_v10, %s585_s23 }
  0x1d   : > { %205 = vrot.lane.b32.xlu0 %v202_v11, %s586_s24  ;;  %219 = vrot.lane.b32.xlu1 %v201_v9, %s587_s25 }
  0x21   : > { %217 = vrot.lane.b32.xlu0 %v216_v12, %s587_s25  ;;  %225 = vrot.lane.b32.xlu1 %v193_v13, %s584_s22 }
  0x25   : > { %229 = vrot.lane.b32.xlu0 %v201_v9, %s588_s26  ;;  %231 = vrot.lane.b32.xlu1 %v202_v11, %s588_s26 }
  0x29   : > { %235 = vrot.lane.b32.xlu0 %v209_v10, %s589_s27  ;;  %237 = vrot.lane.b32.xlu1 %v192_v7, %s589_s27 }
  0x2d   : > { %243 = vrot.lane.b32.xlu0 %v201_v9, %s591_s28  ;;  %245 = vrot.lane.b32.xlu1 %v209_v10, %s591_s28 }
  0x31   : > { %241 = vrot.lane.b32.xlu0 %v216_v12, %s591_s28  ;;  %258 = vrot.lane.b32.xlu1 %v192_v7, %s592_s29 }
  0x35   : > { %260 = vrot.lane.b32.xlu0 %v193_v13, %s592_s29  ;;  %262 = vrot.lane.b32.xlu1 %v257_v16, %s592_s29 }
  0x87   : > { %v224_v17 = vpop.permute.xlu0 %223  ;;  %v213_v18 = vpop.permute.xlu1 %212 }
  0x8b   : > { %v204_v19 = vpop.permute.xlu0 %203  ;;  %v211_v20 = vpop.permute.xlu1 %210 }
  0x8c   : > { %v215_v28 = vsel %vm214_vm4, %v211_v20, %v213_v18 }
  0x8f   : > { %v206_v21 = vpop.permute.xlu0 %205  ;;  %v220_v22 = vpop.permute.xlu1 %219 }
  0x90   : > { %v208_v23 = vsel %vm207_vm0, %v204_v19, %v206_v21  ;;  %v273_v24 = vsel %vm267_vm1, %v193_v13, %v206_v21  ;;  %vm403_vm0 = vcmask 572416  }
  0x91   : > { %v270_v25 = vsel %vm267_vm1, %v192_v7, %v208_v23  ;;  %v278_v26 = vsel %vm274_vm2, %v273_v24, %v213_v18 }
  0x92   : > { %v284_v27 = vsel %vm279_vm3, %v278_v26, %v220_v22  ;;  %v276_v32 = vsel %vm274_vm2, %v270_v25, %v215_v28 }
  0x93   : > { %v218_v29 = vpop.permute.xlu0 %217  ;;  %v226_v30 = vpop.permute.xlu1 %225  ;;  %313 = vmatprep.subr.bf16.mxu0 %v284_v27 }
  0x94   : > { %v222_v31 = vsel %vm221_vm5, %v218_v29, %v220_v22  ;;  %v228_v46 = vsel %vm227_vm9, %v224_v17, %v226_v30  ;;  %vm425_vm9 = vcmask 556032  }
  0x95   : > { %v281_v33 = vsel %vm279_vm3, %v276_v32, %v222_v31 }
  0x96   : > { %314 = vmatpush1.bf16.msra.mxu0 %v281_v33 }
  0x97   : > { %v230_v34 = vpop.permute.xlu0 %229  ;;  %v232_v35 = vpop.permute.xlu1 %231 }
  0x98   : > { %v291_v38 = vsel %vm267_vm1, %v226_v30, %v232_v35  ;;  %v234_v41 = vsel %vm233_vm6, %v230_v34, %v232_v35  ;;  %vm415_vm6 = vcmask 211968  }
  0x99   : > { %v288_v47 = vsel %vm267_vm1, %v228_v46, %v234_v41  ;;  %v603_v41 = vmov (!%p535_p4), 0  }
  0x9a   : > { %571 = vset.pattern.permute.xlu0 (!%p535_p4), %v603_v41  ;;  %572 = vset.pattern.permute.xlu1 (!%p535_p4), %v603_v41 }
  0x9b   : > { %v236_v36 = vpop.permute.xlu0 %235  ;;  %v238_v37 = vpop.permute.xlu1 %237 }
  0x9c   : > { %v295_v42 = vsel %vm274_vm2, %v291_v38, %v238_v37  ;;  %v240_v44 = vsel %vm239_vm8, %v236_v36, %v238_v37  ;;  %vm419_vm8 = vcmask 441344  }
  0x9d   : > { %v293_v51 = vsel %vm274_vm2, %v288_v47, %v240_v44  ;;  %vm407_vm2 = vcmask 801792  }
  0x9f   : > { %v244_v39 = vpop.permute.xlu0 %243  ;;  %v246_v40 = vpop.permute.xlu1 %245 }
  0xa0   : > { %v249_v43 = vsel %vm247_vm7, %v244_v39, %v246_v40 }
  0xa1   : > { %v300_v45 = vsel %vm279_vm3, %v295_v42, %v249_v43 }
  0xa2   : > { %315 = vmatprep.subr.bf16.mxu0 %v300_v45 }
  0xa3   : > { %v242_v48 = vpop.permute.xlu0 %241  ;;  %v259_v49 = vpop.permute.xlu1 %258 }
  0xa4   : > { %v248_v50 = vsel %vm247_vm7, %v242_v48, %v244_v39  ;;  %vm417_vm7 = vcmask 326656  }
  0xa5   : > { %v297_v52 = vsel %vm279_vm3, %v293_v51, %v248_v50  ;;  %vm413_vm3 = vcmask 97280  }
  0xa6   : > { %316 = vmatpush1.bf16.msra.mxu0 %v297_v52 }
  0xa7   : > { %v261_v53 = vpop.permute.xlu0 %260  ;;  %v263_v54 = vpop.permute.xlu1 %262 }
  0xa8   : > { %v265_v55 = vsel %vm264_vm10, %v259_v49, %v261_v53  ;;  %v266_v56 = vsel %vm264_vm10, %v261_v53, %v263_v54  ;;  %v465_v54 = vld [vmem:[%s723_s2] sm:$0xff] (!%p535_p4) }
  0xa9   : > { %531 = vmatprep.subr.msk.bf16.mxu0 %vm267_vm1, %v266_v56  ;;  %v308_v57 = vsel %vm267_vm1, %v265_v55, 0  ;;  %vm405_vm1 = vcmask 687104  }
  0xaa   : > { %318 = vmatpush1.bf16.msra.mxu0 %v308_v57  ;;  %v467_v57 = vld [vmem:[%s724_s3] sm:$0xff] (!%p535_p4) }
  0xad   : > { %532 = vmatmul.mubr.msk.bf16.vlgmr.msra.gmra.mrb[0].mxu0 %vm303_vm11, %v302_v58 }
 0x180   : > { %v347_v59 = vpop.f32.mrb[0].mxu0 }
 0x181   : > { %358 = vrot.lane.b32.xlu1 %v347_v59, %s593_s6  ;;  %355 = vrot.lane.b32.xlu0 %v347_v59, %s585_s23  ;;  %v349_v60 = vpop.f32.mrb[1].mxu0 }
 0x182   : > { %v351_v61 = vpop.f32.mrb[2].mxu0 }
 0x183   : > { %v352_v62 = vpop.f32.mrb[3].mxu0 }
 0x185   : > { %364 = vrot.lane.b32.xlu1 %v347_v59, %s594_s7  ;;  %361 = vrot.lane.b32.xlu0 %v347_v59, %s595_s8 }
 0x189   : > { %370 = vrot.lane.b32.xlu1 %v347_v59, %s596_s9  ;;  %367 = vrot.lane.b32.xlu0 %v347_v59, %s597_s10 }
 0x18d   : > { %373 = vrot.lane.b32.xlu0 %v347_v59, %s598_s11  ;;  %383 = vrot.lane.b32.xlu1 %v349_v60, %s599_s12 }
 0x191   : > { %386 = vrot.lane.b32.xlu1 %v349_v60, %s600_s13  ;;  %380 = vrot.lane.b32.xlu0 %v349_v60, %s588_s26 }
 0x195   : > { %389 = vrot.lane.b32.xlu1 %v349_v60, %s601_s14  ;;  %377 = vrot.lane.b32.xlu0 %v349_v60, %s587_s25 }
 0x199   : > { %392 = vrot.lane.b32.xlu0 %v349_v60, %s602_s17 }
 0x1f3   : > { %v359_v63 = vpop.permute.xlu1 %358  ;;  %v356_v0 = vpop.permute.xlu0 %355 }
 0x1f4   : > { %v396_v3 = vsel %vm395_vm12, %v347_v59, %v356_v0 }
 0x1f5   : > { %v398_v6 = vsel %vm397_vm13, %v396_v3, %v359_v63 }
 0x1f7   : > { %v365_v1 = vpop.permute.xlu1 %364  ;;  %v362_v2 = vpop.permute.xlu0 %361 }
 0x1f8   : > { %v400_v7 = vsel %vm399_vm14, %v398_v6, %v362_v2 }
 0x1f9   : > { %v402_v10 = vsel %vm401_vm15, %v400_v7, %v365_v1 }
 0x1fb   : > { %v371_v4 = vpop.permute.xlu1 %370  ;;  %v368_v5 = vpop.permute.xlu0 %367 }
 0x1fc   : > { %v404_v11 = vsel %vm403_vm0, %v402_v10, %v368_v5 }
 0x1fd   : > { %v406_v14 = vsel %vm405_vm1, %v404_v11, %v371_v4 }
 0x1ff   : > { %v374_v8 = vpop.permute.xlu0 %373  ;;  %v384_v9 = vpop.permute.xlu1 %383 }
 0x200   : > { %v408_v15 = vsel %vm407_vm2, %v406_v14, %v374_v8 }
 0x203   : > { %v387_v12 = vpop.permute.xlu1 %386  ;;  %v381_v13 = vpop.permute.xlu0 %380 }
 0x204   : > { %v414_v16 = vsel %vm413_vm3, %v381_v13, %v384_v9 }
 0x205   : > { %v416_v21 = vsel %vm415_vm6, %v414_v16, %v387_v12 }
 0x207   : > { %v378_v17 = vpop.permute.xlu0 %377  ;;  %v390_v18 = vpop.permute.xlu1 %389  ;;  %430 = sbr.rel (%p535_p4) target bundleno = 845 (0x34d), region = 40 }
 0x208   : > { %v410_v19 = vsel %vm221_vm5, %v408_v15, %v378_v17  ;;  %v418_v22 = vsel %vm417_vm7, %v416_v21, %v390_v18 }
 0x209   : > { %v412_v20 = vsel %vm214_vm4, %v410_v19, %v381_v13 }
 0x20a   : > { %424 = vst [vmem:[%s423_s21] sm:$0xff] %v412_v20 }
 0x20b   : > { %v393_v23 = vpop.permute.xlu0 %392 }
 0x20c   : > { %v420_v24 = vsel %vm419_vm8, %v418_v22, %v393_v23 }
 0x20d   : > { %426 = vst.msk [vmem:[%s423_s21 + $0x8] sm:$0xff] %vm425_vm9, %v420_v24 }
 0x214   : > { %v431_v25 = vld [vmem:[%s725_s4] sm:$0xff]  ;;  %v432_v26 = vld [vmem:[%s725_s4 + $0x8] sm:$0xff]  ;;  %v433_v27 = vld [vmem:[%s725_s4 + $0x10] sm:$0xff] }
 0x215   : > { %v435_v28 = vsel %vm425_vm9, %v432_v26, 0.0  ;;  %v443_v29 = vmul.f32 %v431_v25, %v431_v25  ;;  %v444_v30 = vmul.f32 %v432_v26, %v432_v26  ;;  %v434_v31 = vld [vmem:[%s725_s4 + $0x18] sm:$0xff]  ;;  %v445_v34 = vmul.f32 %v433_v27, %v433_v27 }
 0x216   : > { %v436_v32 = vadd.f32 %v435_v28, %v431_v25  ;;  %v439_v33 = vsel %vm425_vm9, %v434_v31, 0.0  ;;  %v446_v35 = vmul.f32 %v434_v31, %v434_v31 }
 0x217   : > { %v447_v36 = vsel %vm425_vm9, %v444_v30, 0.0  ;;  %v440_v38 = vadd.f32 %v439_v33, %v433_v27 }
 0x218   : > { %437 = vadd.xlane.f32.xlu0 %v436_v32  ;;  %v448_v37 = vadd.f32 %v447_v36, %v443_v29  ;;  %v451_v39 = vsel %vm425_vm9, %v446_v35, 0.0 }
 0x219   : > { %v452_v40 = vadd.f32 %v451_v39, %v445_v34 }
 0x21a   : > { %449 = vadd.xlane.f32.xlu1 %v448_v37 }
 0x21c   : > { %441 = vadd.xlane.f32.xlu0 %v440_v38 }
 0x21e   : > { %453 = vadd.xlane.f32.xlu1 %v452_v40 }
 0x2a5   : > { %v438_v42 = vpop.xlane.xlu0 %437 }
 0x2a7   : > { %v450_v43 = vpop.xlane.xlu1 %449 }
 0x2a9   : > { %v442_v44 = vpop.xlane.xlu0 %441 }
 0x2aa   : > { %v455_v45 = vadd.f32 %v442_v44, %v438_v42 }
 0x2ab   : > { %v454_v46 = vpop.xlane.xlu1 %453 }
 0x2ac   : > { %v457_v47 = vmul.f32 0.0025510204, %v455_v45  ;;  %v458_v48 = vadd.f32 %v454_v46, %v450_v43 }
 0x2ae   : > { %v460_v49 = vmul.f32 %v457_v47, %v457_v47  ;;  %v459_v50 = vmul.f32 0.0025510204, %v458_v48 }
 0x2b0   : > { %v461_v51 = vsub.f32 %v459_v50, %v460_v49 }
 0x2b2   : > { %v462_v52 = vmax.f32 %v461_v51, 0.0 }
 0x2b4   : > { %v463_v53 = vadd.f32 1e-05, %v462_v52 }
 0x2b6   : > { %573 = vrsqrt.f32 %v463_v53 }
 0x2c0   : > { %v574_v55 = vpop.eup %573 }
 0x2c1   : > { %v466_v56 = vmul.f32 %v574_v55, %v465_v54 }
 0x2c3   : > { %472 = vperm.xlu0 %571, %v466_v56   ;;  %v468_v58 = vmul.f32 %v466_v56, %v457_v47 }
 0x2c5   : > { %v469_v59 = vsub.f32 %v467_v57, %v468_v58 }
 0x2c7   : > { %481 = vperm.xlu1 %572, %v469_v59  }
 0x342   : > { %v473_v60 = vpop.permute.xlu0 %472 }
 0x343   : > { %v475_v61 = vmul.f32 %v473_v60, %v431_v25  ;;  %v476_v62 = vmul.f32 %v473_v60, %v432_v26  ;;  %v477_v63 = vmul.f32 %v473_v60, %v433_v27  ;;  %v478_v0 = vmul.f32 %v473_v60, %v434_v31 }
 0x346   : > { %v482_v1 = vpop.permute.xlu1 %481 }
 0x347   : > { %v484_v2 = vadd.f32 %v482_v1, %v475_v61  ;;  %v485_v3 = vadd.f32 %v482_v1, %v476_v62  ;;  %v486_v4 = vadd.f32 %v482_v1, %v477_v63  ;;  %v487_v5 = vadd.f32 %v482_v1, %v478_v0 }
 0x349   : > { %v488_v6 = vmax.f32 %v484_v2, 0.0  ;;  %v489_v7 = vmax.f32 %v485_v3, 0.0  ;;  %v490_v8 = vmax.f32 %v486_v4, 0.0  ;;  %v491_v9 = vmax.f32 %v487_v5, 0.0 }
 0x34b   : > { %492 = vst [vmem:[%s725_s4] sm:$0xff] %v488_v6  ;;  %493 = vst.msk [vmem:[%s725_s4 + $0x8] sm:$0xff] %vm425_vm9, %v489_v7 }
 0x34c   : > { %494 = vst [vmem:[%s725_s4 + $0x10] sm:$0xff] %v490_v8  ;;  %495 = vst.msk [vmem:[%s725_s4 + $0x18] sm:$0xff] %vm425_vm9, %v491_v9 }
 0x34d PF: > { %s14_s15 = sadd.s32 1, %s581_s15  }
 0x34e   : > { %p11_p5 = scmp.ge.s32.totalorder %s14_s15, 4  }
 0x350   :  { %13 = sbr.rel (!%p11_p5) target bundleno = 1 (0x1), region = 67 }

</bundles_post_ra>
